<compile_context>
chip_gen: v5e
topology: v5e:2x2
jax: 0.10.0
libtpu: 0.0.40
codegen_flags: <defaults>
</compile_context>

<pallas_src>
import functools

import jax
import jax.numpy as jnp
from jax import lax
from jax.experimental import pallas as pl
from jax.experimental.pallas import tpu as pltpu


def _round_up(x: int, m: int) -> int:
    return (x + m - 1) // m * m


def cbow_kernel(idx_ref, emb_ref, w_ref, b_ref, out_ref, sum_ref, *,
                context: int, batch_tile: int):
    # idx_ref : SMEM (B_pad*C,) int32   -- scalar-prefetched token ids
    # emb_ref : VMEM (V, E_pad) f32     -- embedding table (resident)
    # w_ref   : VMEM (V, E_pad) f32     -- linear weight, PyTorch layout (V, E)
    # b_ref   : VMEM (1, V)    f32      -- linear bias
    # out_ref : VMEM (TB, V)   f32      -- log-probs for this batch tile
    # sum_ref : VMEM (TB, E_pad) f32    -- scratch: summed context embeddings
    base = pl.program_id(0) * batch_tile * context

    # --- Embedding gather + sum over context window (scalar-indexed rows) ---
    def gather_row(b, carry):
        off = base + b * context
        acc = emb_ref[idx_ref[off], :]                 # (E_pad,) dynamic row load
        for c in range(1, context):                    # context is static -> unrolled
            acc = acc + emb_ref[idx_ref[off + c], :]
        sum_ref[b, :] = acc
        return carry

    lax.fori_loop(0, batch_tile, gather_row, 0, unroll=(batch_tile <= 32))

    # --- Sigmoid (EUP) ---
    h = jax.nn.sigmoid(sum_ref[...])                   # (TB, E_pad)

    # --- Linear: h @ W^T + b, contracting over E without materializing W^T ---
    logits = lax.dot_general(
        h, w_ref[...],
        dimension_numbers=(((1,), (1,)), ((), ())),
        preferred_element_type=jnp.float32,
    ) + b_ref[...]                                     # (TB, V)

    # --- LogSoftmax over the vocab dim (V fits one block here) ---
    m = jnp.max(logits, axis=-1, keepdims=True)
    shifted = logits - m
    lse = jnp.log(jnp.sum(jnp.exp(shifted), axis=-1, keepdims=True))
    out_ref[...] = shifted - lse


def prepare_params(emb_table, lin_w, lin_b):
    """One-time parameter prep: pad E to a 128-lane multiple (zeros), keep
    the PyTorch (V, E) layout for the linear weight (no transpose)."""
    V, E = emb_table.shape
    e_pad = _round_up(E, 128)
    emb_pad = jnp.pad(emb_table, ((0, 0), (0, e_pad - E)))
    w_pad = jnp.pad(lin_w, ((0, 0), (0, e_pad - E)))
    bias2d = lin_b.reshape(1, V)
    return emb_pad, w_pad, bias2d


def cbow_forward(x_idx, emb_pad, w_pad, bias2d, *, batch_tile=128):
    """x_idx: (B, C) int32; emb_pad/w_pad: (V, E_pad) f32; bias2d: (1, V) f32."""
    B, C = x_idx.shape
    V, E_pad = emb_pad.shape

    tb = min(batch_tile, _round_up(B, 8))              # batch tile (sublane-aligned)
    B_pad = _round_up(B, tb)
    # Pad batch with token 0 (in-range -> finite garbage rows, sliced off below).
    idx_flat = jnp.pad(x_idx, ((0, B_pad - B), (0, 0))).reshape(-1).astype(jnp.int32)

    grid_spec = pltpu.PrefetchScalarGridSpec(
        num_scalar_prefetch=1,                         # idx -> SMEM, feeds gather
        grid=(B_pad // tb,),
        in_specs=[
            pl.BlockSpec((V, E_pad), lambda i, idx: (0, 0)),   # emb table (resident)
            pl.BlockSpec((V, E_pad), lambda i, idx: (0, 0)),   # linear weight (resident)
            pl.BlockSpec((1, V),     lambda i, idx: (0, 0)),   # bias
        ],
        out_specs=pl.BlockSpec((tb, V), lambda i, idx: (i, 0)),
        scratch_shapes=[pltpu.VMEM((tb, E_pad), jnp.float32)],
    )

    out = pl.pallas_call(
        functools.partial(cbow_kernel, context=C, batch_tile=tb),
        out_shape=jax.ShapeDtypeStruct((B_pad, V), jnp.float32),
        grid_spec=grid_spec,
        compiler_params=pltpu.CompilerParams(
            dimension_semantics=("parallel",),         # batch tiles -> both TCs on v7x
        ),
    )(idx_flat, emb_pad, w_pad, bias2d)

    return out[:B]


def cbow_reference(x_idx, emb_table, lin_w, lin_b):
    emb = jnp.take(emb_table, x_idx, axis=0)           # (B, C, E)
    s = jnp.sum(emb, axis=1)                           # (B, E)
    h = jax.nn.sigmoid(s)
    logits = h @ lin_w.T + lin_b                       # (B, V)
    return jax.nn.log_softmax(logits, axis=1)


if __name__ == "__main__":
    VOCAB, EMBED = 128, 32
    BATCH, CONTEXT = 8, 4

    key = jax.random.PRNGKey(0)
    k_idx, k_emb, k_w, k_b = jax.random.split(key, 4)

    x_idx = jax.random.randint(k_idx, (BATCH, CONTEXT), 0, VOCAB, dtype=jnp.int32)
    emb_table = jax.random.normal(k_emb, (VOCAB, EMBED), dtype=jnp.float32)
    bound = 1.0 / (EMBED ** 0.5)
    lin_w = jax.random.uniform(k_w, (VOCAB, EMBED), minval=-bound, maxval=bound,
                               dtype=jnp.float32)
    lin_b = jax.random.uniform(k_b, (VOCAB,), minval=-bound, maxval=bound,
                               dtype=jnp.float32)

    emb_pad, w_pad, bias2d = prepare_params(emb_table, lin_w, lin_b)
    out = cbow_forward(x_idx, emb_pad, w_pad, bias2d)
    out = jax.block_until_ready(out)

    ref = cbow_reference(x_idx, emb_table, lin_w, lin_b)
    assert out.shape == (BATCH, VOCAB)
    assert jnp.allclose(out, ref, atol=1e-5, rtol=1e-5), "mismatch vs reference"

    print("KERNEL_OK")
</pallas_src>

<mosaic_0001>
module attributes {stable_mosaic.version = 11 : i64} {
  func.func @cbow_kernel(%arg0: i32, %arg1: memref<32xi32, #tpu.memory_space<smem>>, %arg2: memref<128x128xf32, #tpu.memory_space<vmem>>, %arg3: memref<128x128xf32, #tpu.memory_space<vmem>>, %arg4: memref<1x128xf32, #tpu.memory_space<vmem>>, %arg5: memref<8x128xf32, #tpu.memory_space<vmem>>, %arg6: memref<8x128xf32, #tpu.memory_space<vmem>>) attributes {dimension_semantics = [#tpu.dimension_semantics<parallel>], iteration_bounds = array<i64: 1>, scalar_prefetch = 1 : i64, scratch_operands = 1 : i64, tpu.core_type = #tpu.core_type<tc>, window_params = [{pipeline_mode = #tpu.pipeline_mode<synchronous>, transform_indices = @transform_0, window_bounds = array<i64: 128, 128>}, {pipeline_mode = #tpu.pipeline_mode<synchronous>, transform_indices = @transform_1, window_bounds = array<i64: 128, 128>}, {pipeline_mode = #tpu.pipeline_mode<synchronous>, transform_indices = @transform_2, window_bounds = array<i64: 1, 128>}, {transform_indices = @transform_3, window_bounds = array<i64: 8, 128>}]} {
    %c8_i32 = arith.constant 8 : i32
    %0 = arith.muli %arg0, %c8_i32 : i32
    %c4_i32 = arith.constant 4 : i32
    %1 = arith.muli %0, %c4_i32 : i32
    %c0_i32 = arith.constant 0 : i32
    %c4_i32_0 = arith.constant 4 : i32
    %2 = arith.muli %c0_i32, %c4_i32_0 : i32
    %3 = arith.addi %1, %2 : i32
    %4 = arith.index_cast %3 : i32 to index
    %5 = memref.load %arg1[%4] : memref<32xi32, #tpu.memory_space<smem>>
    %6 = arith.index_cast %5 : i32 to index
    %c0 = arith.constant 0 : index
    %7 = vector.load %arg2[%6, %c0] : memref<128x128xf32, #tpu.memory_space<vmem>>, vector<1x128xf32>
    %8 = vector.shape_cast %7 : vector<1x128xf32> to vector<128xf32>
    %c1_i32 = arith.constant 1 : i32
    %9 = arith.addi %3, %c1_i32 : i32
    %10 = arith.index_cast %9 : i32 to index
    %11 = memref.load %arg1[%10] : memref<32xi32, #tpu.memory_space<smem>>
    %12 = arith.index_cast %11 : i32 to index
    %c0_1 = arith.constant 0 : index
    %13 = vector.load %arg2[%12, %c0_1] : memref<128x128xf32, #tpu.memory_space<vmem>>, vector<1x128xf32>
    %14 = vector.shape_cast %13 : vector<1x128xf32> to vector<128xf32>
    %15 = arith.addf %8, %14 : vector<128xf32>
    %c2_i32 = arith.constant 2 : i32
    %16 = arith.addi %3, %c2_i32 : i32
    %17 = arith.index_cast %16 : i32 to index
    %18 = memref.load %arg1[%17] : memref<32xi32, #tpu.memory_space<smem>>
    %19 = arith.index_cast %18 : i32 to index
    %c0_2 = arith.constant 0 : index
    %20 = vector.load %arg2[%19, %c0_2] : memref<128x128xf32, #tpu.memory_space<vmem>>, vector<1x128xf32>
    %21 = vector.shape_cast %20 : vector<1x128xf32> to vector<128xf32>
    %22 = arith.addf %15, %21 : vector<128xf32>
    %c3_i32 = arith.constant 3 : i32
    %23 = arith.addi %3, %c3_i32 : i32
    %24 = arith.index_cast %23 : i32 to index
    %25 = memref.load %arg1[%24] : memref<32xi32, #tpu.memory_space<smem>>
    %26 = arith.index_cast %25 : i32 to index
    %c0_3 = arith.constant 0 : index
    %27 = vector.load %arg2[%26, %c0_3] : memref<128x128xf32, #tpu.memory_space<vmem>>, vector<1x128xf32>
    %28 = vector.shape_cast %27 : vector<1x128xf32> to vector<128xf32>
    %29 = arith.addf %22, %28 : vector<128xf32>
    %30 = arith.index_cast %c0_i32 : i32 to index
    %c0_4 = arith.constant 0 : index
    %31 = vector.load %arg6[%30, %c0_4] : memref<8x128xf32, #tpu.memory_space<vmem>>, vector<1x128xf32>
    %32 = vector.shape_cast %31 : vector<1x128xf32> to vector<128xf32>
    %33 = vector.shape_cast %29 : vector<128xf32> to vector<1x128xf32>
    tpu.vector_store %arg6[%30, %c0_4], %33 {strides = array<i32>} : memref<8x128xf32, #tpu.memory_space<vmem>>, vector<1x128xf32>,
    %c1_i32_5 = arith.constant 1 : i32
    %c4_i32_6 = arith.constant 4 : i32
    %34 = arith.muli %c1_i32_5, %c4_i32_6 : i32
    %35 = arith.addi %1, %34 : i32
    %36 = arith.index_cast %35 : i32 to index
    %37 = memref.load %arg1[%36] : memref<32xi32, #tpu.memory_space<smem>>
    %38 = arith.index_cast %37 : i32 to index
    %c0_7 = arith.constant 0 : index
    %39 = vector.load %arg2[%38, %c0_7] : memref<128x128xf32, #tpu.memory_space<vmem>>, vector<1x128xf32>
    %40 = vector.shape_cast %39 : vector<1x128xf32> to vector<128xf32>
    %c1_i32_8 = arith.constant 1 : i32
    %41 = arith.addi %35, %c1_i32_8 : i32
    %42 = arith.index_cast %41 : i32 to index
    %43 = memref.load %arg1[%42] : memref<32xi32, #tpu.memory_space<smem>>
    %44 = arith.index_cast %43 : i32 to index
    %c0_9 = arith.constant 0 : index
    %45 = vector.load %arg2[%44, %c0_9] : memref<128x128xf32, #tpu.memory_space<vmem>>, vector<1x128xf32>
    %46 = vector.shape_cast %45 : vector<1x128xf32> to vector<128xf32>
    %47 = arith.addf %40, %46 : vector<128xf32>
    %c2_i32_10 = arith.constant 2 : i32
    %48 = arith.addi %35, %c2_i32_10 : i32
    %49 = arith.index_cast %48 : i32 to index
    %50 = memref.load %arg1[%49] : memref<32xi32, #tpu.memory_space<smem>>
    %51 = arith.index_cast %50 : i32 to index
    %c0_11 = arith.constant 0 : index
    %52 = vector.load %arg2[%51, %c0_11] : memref<128x128xf32, #tpu.memory_space<vmem>>, vector<1x128xf32>
    %53 = vector.shape_cast %52 : vector<1x128xf32> to vector<128xf32>
    %54 = arith.addf %47, %53 : vector<128xf32>
    %c3_i32_12 = arith.constant 3 : i32
    %55 = arith.addi %35, %c3_i32_12 : i32
    %56 = arith.index_cast %55 : i32 to index
    %57 = memref.load %arg1[%56] : memref<32xi32, #tpu.memory_space<smem>>
    %58 = arith.index_cast %57 : i32 to index
    %c0_13 = arith.constant 0 : index
    %59 = vector.load %arg2[%58, %c0_13] : memref<128x128xf32, #tpu.memory_space<vmem>>, vector<1x128xf32>
    %60 = vector.shape_cast %59 : vector<1x128xf32> to vector<128xf32>
    %61 = arith.addf %54, %60 : vector<128xf32>
    %62 = arith.index_cast %c1_i32_5 : i32 to index
    %c0_14 = arith.constant 0 : index
    %63 = vector.load %arg6[%62, %c0_14] : memref<8x128xf32, #tpu.memory_space<vmem>>, vector<1x128xf32>
    %64 = vector.shape_cast %63 : vector<1x128xf32> to vector<128xf32>
    %65 = vector.shape_cast %61 : vector<128xf32> to vector<1x128xf32>
    tpu.vector_store %arg6[%62, %c0_14], %65 {strides = array<i32>} : memref<8x128xf32, #tpu.memory_space<vmem>>, vector<1x128xf32>,
    %c2_i32_15 = arith.constant 2 : i32
    %c4_i32_16 = arith.constant 4 : i32
    %66 = arith.muli %c2_i32_15, %c4_i32_16 : i32
    %67 = arith.addi %1, %66 : i32
    %68 = arith.index_cast %67 : i32 to index
    %69 = memref.load %arg1[%68] : memref<32xi32, #tpu.memory_space<smem>>
    %70 = arith.index_cast %69 : i32 to index
    %c0_17 = arith.constant 0 : index
    %71 = vector.load %arg2[%70, %c0_17] : memref<128x128xf32, #tpu.memory_space<vmem>>, vector<1x128xf32>
    %72 = vector.shape_cast %71 : vector<1x128xf32> to vector<128xf32>
    %c1_i32_18 = arith.constant 1 : i32
    %73 = arith.addi %67, %c1_i32_18 : i32
    %74 = arith.index_cast %73 : i32 to index
    %75 = memref.load %arg1[%74] : memref<32xi32, #tpu.memory_space<smem>>
    %76 = arith.index_cast %75 : i32 to index
    %c0_19 = arith.constant 0 : index
    %77 = vector.load %arg2[%76, %c0_19] : memref<128x128xf32, #tpu.memory_space<vmem>>, vector<1x128xf32>
    %78 = vector.shape_cast %77 : vector<1x128xf32> to vector<128xf32>
    %79 = arith.addf %72, %78 : vector<128xf32>
    %c2_i32_20 = arith.constant 2 : i32
    %80 = arith.addi %67, %c2_i32_20 : i32
    %81 = arith.index_cast %80 : i32 to index
    %82 = memref.load %arg1[%81] : memref<32xi32, #tpu.memory_space<smem>>
    %83 = arith.index_cast %82 : i32 to index
    %c0_21 = arith.constant 0 : index
    %84 = vector.load %arg2[%83, %c0_21] : memref<128x128xf32, #tpu.memory_space<vmem>>, vector<1x128xf32>
    %85 = vector.shape_cast %84 : vector<1x128xf32> to vector<128xf32>
    %86 = arith.addf %79, %85 : vector<128xf32>
    %c3_i32_22 = arith.constant 3 : i32
    %87 = arith.addi %67, %c3_i32_22 : i32
    %88 = arith.index_cast %87 : i32 to index
    %89 = memref.load %arg1[%88] : memref<32xi32, #tpu.memory_space<smem>>
    %90 = arith.index_cast %89 : i32 to index
    %c0_23 = arith.constant 0 : index
    %91 = vector.load %arg2[%90, %c0_23] : memref<128x128xf32, #tpu.memory_space<vmem>>, vector<1x128xf32>
    %92 = vector.shape_cast %91 : vector<1x128xf32> to vector<128xf32>
    %93 = arith.addf %86, %92 : vector<128xf32>
    %94 = arith.index_cast %c2_i32_15 : i32 to index
    %c0_24 = arith.constant 0 : index
    %95 = vector.load %arg6[%94, %c0_24] : memref<8x128xf32, #tpu.memory_space<vmem>>, vector<1x128xf32>
    %96 = vector.shape_cast %95 : vector<1x128xf32> to vector<128xf32>
    %97 = vector.shape_cast %93 : vector<128xf32> to vector<1x128xf32>
    tpu.vector_store %arg6[%94, %c0_24], %97 {strides = array<i32>} : memref<8x128xf32, #tpu.memory_space<vmem>>, vector<1x128xf32>,
    %c3_i32_25 = arith.constant 3 : i32
    %c4_i32_26 = arith.constant 4 : i32
    %98 = arith.muli %c3_i32_25, %c4_i32_26 : i32
    %99 = arith.addi %1, %98 : i32
    %100 = arith.index_cast %99 : i32 to index
    %101 = memref.load %arg1[%100] : memref<32xi32, #tpu.memory_space<smem>>
    %102 = arith.index_cast %101 : i32 to index
    %c0_27 = arith.constant 0 : index
    %103 = vector.load %arg2[%102, %c0_27] : memref<128x128xf32, #tpu.memory_space<vmem>>, vector<1x128xf32>
    %104 = vector.shape_cast %103 : vector<1x128xf32> to vector<128xf32>
    %c1_i32_28 = arith.constant 1 : i32
    %105 = arith.addi %99, %c1_i32_28 : i32
    %106 = arith.index_cast %105 : i32 to index
    %107 = memref.load %arg1[%106] : memref<32xi32, #tpu.memory_space<smem>>
    %108 = arith.index_cast %107 : i32 to index
    %c0_29 = arith.constant 0 : index
    %109 = vector.load %arg2[%108, %c0_29] : memref<128x128xf32, #tpu.memory_space<vmem>>, vector<1x128xf32>
    %110 = vector.shape_cast %109 : vector<1x128xf32> to vector<128xf32>
    %111 = arith.addf %104, %110 : vector<128xf32>
    %c2_i32_30 = arith.constant 2 : i32
    %112 = arith.addi %99, %c2_i32_30 : i32
    %113 = arith.index_cast %112 : i32 to index
    %114 = memref.load %arg1[%113] : memref<32xi32, #tpu.memory_space<smem>>
    %115 = arith.index_cast %114 : i32 to index
    %c0_31 = arith.constant 0 : index
    %116 = vector.load %arg2[%115, %c0_31] : memref<128x128xf32, #tpu.memory_space<vmem>>, vector<1x128xf32>
    %117 = vector.shape_cast %116 : vector<1x128xf32> to vector<128xf32>
    %118 = arith.addf %111, %117 : vector<128xf32>
    %c3_i32_32 = arith.constant 3 : i32
    %119 = arith.addi %99, %c3_i32_32 : i32
    %120 = arith.index_cast %119 : i32 to index
    %121 = memref.load %arg1[%120] : memref<32xi32, #tpu.memory_space<smem>>
    %122 = arith.index_cast %121 : i32 to index
    %c0_33 = arith.constant 0 : index
    %123 = vector.load %arg2[%122, %c0_33] : memref<128x128xf32, #tpu.memory_space<vmem>>, vector<1x128xf32>
    %124 = vector.shape_cast %123 : vector<1x128xf32> to vector<128xf32>
    %125 = arith.addf %118, %124 : vector<128xf32>
    %126 = arith.index_cast %c3_i32_25 : i32 to index
    %c0_34 = arith.constant 0 : index
    %127 = vector.load %arg6[%126, %c0_34] : memref<8x128xf32, #tpu.memory_space<vmem>>, vector<1x128xf32>
    %128 = vector.shape_cast %127 : vector<1x128xf32> to vector<128xf32>
    %129 = vector.shape_cast %125 : vector<128xf32> to vector<1x128xf32>
    tpu.vector_store %arg6[%126, %c0_34], %129 {strides = array<i32>} : memref<8x128xf32, #tpu.memory_space<vmem>>, vector<1x128xf32>,
    %c4_i32_35 = arith.constant 4 : i32
    %c4_i32_36 = arith.constant 4 : i32
    %130 = arith.muli %c4_i32_35, %c4_i32_36 : i32
    %131 = arith.addi %1, %130 : i32
    %132 = arith.index_cast %131 : i32 to index
    %133 = memref.load %arg1[%132] : memref<32xi32, #tpu.memory_space<smem>>
    %134 = arith.index_cast %133 : i32 to index
    %c0_37 = arith.constant 0 : index
    %135 = vector.load %arg2[%134, %c0_37] : memref<128x128xf32, #tpu.memory_space<vmem>>, vector<1x128xf32>
    %136 = vector.shape_cast %135 : vector<1x128xf32> to vector<128xf32>
    %c1_i32_38 = arith.constant 1 : i32
    %137 = arith.addi %131, %c1_i32_38 : i32
    %138 = arith.index_cast %137 : i32 to index
    %139 = memref.load %arg1[%138] : memref<32xi32, #tpu.memory_space<smem>>
    %140 = arith.index_cast %139 : i32 to index
    %c0_39 = arith.constant 0 : index
    %141 = vector.load %arg2[%140, %c0_39] : memref<128x128xf32, #tpu.memory_space<vmem>>, vector<1x128xf32>
    %142 = vector.shape_cast %141 : vector<1x128xf32> to vector<128xf32>
    %143 = arith.addf %136, %142 : vector<128xf32>
    %c2_i32_40 = arith.constant 2 : i32
    %144 = arith.addi %131, %c2_i32_40 : i32
    %145 = arith.index_cast %144 : i32 to index
    %146 = memref.load %arg1[%145] : memref<32xi32, #tpu.memory_space<smem>>
    %147 = arith.index_cast %146 : i32 to index
    %c0_41 = arith.constant 0 : index
    %148 = vector.load %arg2[%147, %c0_41] : memref<128x128xf32, #tpu.memory_space<vmem>>, vector<1x128xf32>
    %149 = vector.shape_cast %148 : vector<1x128xf32> to vector<128xf32>
    %150 = arith.addf %143, %149 : vector<128xf32>
    %c3_i32_42 = arith.constant 3 : i32
    %151 = arith.addi %131, %c3_i32_42 : i32
    %152 = arith.index_cast %151 : i32 to index
    %153 = memref.load %arg1[%152] : memref<32xi32, #tpu.memory_space<smem>>
    %154 = arith.index_cast %153 : i32 to index
    %c0_43 = arith.constant 0 : index
    %155 = vector.load %arg2[%154, %c0_43] : memref<128x128xf32, #tpu.memory_space<vmem>>, vector<1x128xf32>
    %156 = vector.shape_cast %155 : vector<1x128xf32> to vector<128xf32>
    %157 = arith.addf %150, %156 : vector<128xf32>
    %158 = arith.index_cast %c4_i32_35 : i32 to index
    %c0_44 = arith.constant 0 : index
    %159 = vector.load %arg6[%158, %c0_44] : memref<8x128xf32, #tpu.memory_space<vmem>>, vector<1x128xf32>
    %160 = vector.shape_cast %159 : vector<1x128xf32> to vector<128xf32>
    %161 = vector.shape_cast %157 : vector<128xf32> to vector<1x128xf32>
    tpu.vector_store %arg6[%158, %c0_44], %161 {strides = array<i32>} : memref<8x128xf32, #tpu.memory_space<vmem>>, vector<1x128xf32>,
    %c5_i32 = arith.constant 5 : i32
    %c4_i32_45 = arith.constant 4 : i32
    %162 = arith.muli %c5_i32, %c4_i32_45 : i32
    %163 = arith.addi %1, %162 : i32
    %164 = arith.index_cast %163 : i32 to index
    %165 = memref.load %arg1[%164] : memref<32xi32, #tpu.memory_space<smem>>
    %166 = arith.index_cast %165 : i32 to index
    %c0_46 = arith.constant 0 : index
    %167 = vector.load %arg2[%166, %c0_46] : memref<128x128xf32, #tpu.memory_space<vmem>>, vector<1x128xf32>
    %168 = vector.shape_cast %167 : vector<1x128xf32> to vector<128xf32>
    %c1_i32_47 = arith.constant 1 : i32
    %169 = arith.addi %163, %c1_i32_47 : i32
    %170 = arith.index_cast %169 : i32 to index
    %171 = memref.load %arg1[%170] : memref<32xi32, #tpu.memory_space<smem>>
    %172 = arith.index_cast %171 : i32 to index
    %c0_48 = arith.constant 0 : index
    %173 = vector.load %arg2[%172, %c0_48] : memref<128x128xf32, #tpu.memory_space<vmem>>, vector<1x128xf32>
    %174 = vector.shape_cast %173 : vector<1x128xf32> to vector<128xf32>
    %175 = arith.addf %168, %174 : vector<128xf32>
    %c2_i32_49 = arith.constant 2 : i32
    %176 = arith.addi %163, %c2_i32_49 : i32
    %177 = arith.index_cast %176 : i32 to index
    %178 = memref.load %arg1[%177] : memref<32xi32, #tpu.memory_space<smem>>
    %179 = arith.index_cast %178 : i32 to index
    %c0_50 = arith.constant 0 : index
    %180 = vector.load %arg2[%179, %c0_50] : memref<128x128xf32, #tpu.memory_space<vmem>>, vector<1x128xf32>
    %181 = vector.shape_cast %180 : vector<1x128xf32> to vector<128xf32>
    %182 = arith.addf %175, %181 : vector<128xf32>
    %c3_i32_51 = arith.constant 3 : i32
    %183 = arith.addi %163, %c3_i32_51 : i32
    %184 = arith.index_cast %183 : i32 to index
    %185 = memref.load %arg1[%184] : memref<32xi32, #tpu.memory_space<smem>>
    %186 = arith.index_cast %185 : i32 to index
    %c0_52 = arith.constant 0 : index
    %187 = vector.load %arg2[%186, %c0_52] : memref<128x128xf32, #tpu.memory_space<vmem>>, vector<1x128xf32>
    %188 = vector.shape_cast %187 : vector<1x128xf32> to vector<128xf32>
    %189 = arith.addf %182, %188 : vector<128xf32>
    %190 = arith.index_cast %c5_i32 : i32 to index
    %c0_53 = arith.constant 0 : index
    %191 = vector.load %arg6[%190, %c0_53] : memref<8x128xf32, #tpu.memory_space<vmem>>, vector<1x128xf32>
    %192 = vector.shape_cast %191 : vector<1x128xf32> to vector<128xf32>
    %193 = vector.shape_cast %189 : vector<128xf32> to vector<1x128xf32>
    tpu.vector_store %arg6[%190, %c0_53], %193 {strides = array<i32>} : memref<8x128xf32, #tpu.memory_space<vmem>>, vector<1x128xf32>,
    %c6_i32 = arith.constant 6 : i32
    %c4_i32_54 = arith.constant 4 : i32
    %194 = arith.muli %c6_i32, %c4_i32_54 : i32
    %195 = arith.addi %1, %194 : i32
    %196 = arith.index_cast %195 : i32 to index
    %197 = memref.load %arg1[%196] : memref<32xi32, #tpu.memory_space<smem>>
    %198 = arith.index_cast %197 : i32 to index
    %c0_55 = arith.constant 0 : index
    %199 = vector.load %arg2[%198, %c0_55] : memref<128x128xf32, #tpu.memory_space<vmem>>, vector<1x128xf32>
    %200 = vector.shape_cast %199 : vector<1x128xf32> to vector<128xf32>
    %c1_i32_56 = arith.constant 1 : i32
    %201 = arith.addi %195, %c1_i32_56 : i32
    %202 = arith.index_cast %201 : i32 to index
    %203 = memref.load %arg1[%202] : memref<32xi32, #tpu.memory_space<smem>>
    %204 = arith.index_cast %203 : i32 to index
    %c0_57 = arith.constant 0 : index
    %205 = vector.load %arg2[%204, %c0_57] : memref<128x128xf32, #tpu.memory_space<vmem>>, vector<1x128xf32>
    %206 = vector.shape_cast %205 : vector<1x128xf32> to vector<128xf32>
    %207 = arith.addf %200, %206 : vector<128xf32>
    %c2_i32_58 = arith.constant 2 : i32
    %208 = arith.addi %195, %c2_i32_58 : i32
    %209 = arith.index_cast %208 : i32 to index
    %210 = memref.load %arg1[%209] : memref<32xi32, #tpu.memory_space<smem>>
    %211 = arith.index_cast %210 : i32 to index
    %c0_59 = arith.constant 0 : index
    %212 = vector.load %arg2[%211, %c0_59] : memref<128x128xf32, #tpu.memory_space<vmem>>, vector<1x128xf32>
    %213 = vector.shape_cast %212 : vector<1x128xf32> to vector<128xf32>
    %214 = arith.addf %207, %213 : vector<128xf32>
    %c3_i32_60 = arith.constant 3 : i32
    %215 = arith.addi %195, %c3_i32_60 : i32
    %216 = arith.index_cast %215 : i32 to index
    %217 = memref.load %arg1[%216] : memref<32xi32, #tpu.memory_space<smem>>
    %218 = arith.index_cast %217 : i32 to index
    %c0_61 = arith.constant 0 : index
    %219 = vector.load %arg2[%218, %c0_61] : memref<128x128xf32, #tpu.memory_space<vmem>>, vector<1x128xf32>
    %220 = vector.shape_cast %219 : vector<1x128xf32> to vector<128xf32>
    %221 = arith.addf %214, %220 : vector<128xf32>
    %222 = arith.index_cast %c6_i32 : i32 to index
    %c0_62 = arith.constant 0 : index
    %223 = vector.load %arg6[%222, %c0_62] : memref<8x128xf32, #tpu.memory_space<vmem>>, vector<1x128xf32>
    %224 = vector.shape_cast %223 : vector<1x128xf32> to vector<128xf32>
    %225 = vector.shape_cast %221 : vector<128xf32> to vector<1x128xf32>
    tpu.vector_store %arg6[%222, %c0_62], %225 {strides = array<i32>} : memref<8x128xf32, #tpu.memory_space<vmem>>, vector<1x128xf32>,
    %c7_i32 = arith.constant 7 : i32
    %c4_i32_63 = arith.constant 4 : i32
    %226 = arith.muli %c7_i32, %c4_i32_63 : i32
    %227 = arith.addi %1, %226 : i32
    %228 = arith.index_cast %227 : i32 to index
    %229 = memref.load %arg1[%228] : memref<32xi32, #tpu.memory_space<smem>>
    %230 = arith.index_cast %229 : i32 to index
    %c0_64 = arith.constant 0 : index
    %231 = vector.load %arg2[%230, %c0_64] : memref<128x128xf32, #tpu.memory_space<vmem>>, vector<1x128xf32>
    %232 = vector.shape_cast %231 : vector<1x128xf32> to vector<128xf32>
    %c1_i32_65 = arith.constant 1 : i32
    %233 = arith.addi %227, %c1_i32_65 : i32
    %234 = arith.index_cast %233 : i32 to index
    %235 = memref.load %arg1[%234] : memref<32xi32, #tpu.memory_space<smem>>
    %236 = arith.index_cast %235 : i32 to index
    %c0_66 = arith.constant 0 : index
    %237 = vector.load %arg2[%236, %c0_66] : memref<128x128xf32, #tpu.memory_space<vmem>>, vector<1x128xf32>
    %238 = vector.shape_cast %237 : vector<1x128xf32> to vector<128xf32>
    %239 = arith.addf %232, %238 : vector<128xf32>
    %c2_i32_67 = arith.constant 2 : i32
    %240 = arith.addi %227, %c2_i32_67 : i32
    %241 = arith.index_cast %240 : i32 to index
    %242 = memref.load %arg1[%241] : memref<32xi32, #tpu.memory_space<smem>>
    %243 = arith.index_cast %242 : i32 to index
    %c0_68 = arith.constant 0 : index
    %244 = vector.load %arg2[%243, %c0_68] : memref<128x128xf32, #tpu.memory_space<vmem>>, vector<1x128xf32>
    %245 = vector.shape_cast %244 : vector<1x128xf32> to vector<128xf32>
    %246 = arith.addf %239, %245 : vector<128xf32>
    %c3_i32_69 = arith.constant 3 : i32
    %247 = arith.addi %227, %c3_i32_69 : i32
    %248 = arith.index_cast %247 : i32 to index
    %249 = memref.load %arg1[%248] : memref<32xi32, #tpu.memory_space<smem>>
    %250 = arith.index_cast %249 : i32 to index
    %c0_70 = arith.constant 0 : index
    %251 = vector.load %arg2[%250, %c0_70] : memref<128x128xf32, #tpu.memory_space<vmem>>, vector<1x128xf32>
    %252 = vector.shape_cast %251 : vector<1x128xf32> to vector<128xf32>
    %253 = arith.addf %246, %252 : vector<128xf32>
    %254 = arith.index_cast %c7_i32 : i32 to index
    %c0_71 = arith.constant 0 : index
    %255 = vector.load %arg6[%254, %c0_71] : memref<8x128xf32, #tpu.memory_space<vmem>>, vector<1x128xf32>
    %256 = vector.shape_cast %255 : vector<1x128xf32> to vector<128xf32>
    %257 = vector.shape_cast %253 : vector<128xf32> to vector<1x128xf32>
    tpu.vector_store %arg6[%254, %c0_71], %257 {strides = array<i32>} : memref<8x128xf32, #tpu.memory_space<vmem>>, vector<1x128xf32>,
    %c8_i32_72 = arith.constant 8 : i32
    %c0_73 = arith.constant 0 : index
    %c0_74 = arith.constant 0 : index
    %258 = vector.load %arg6[%c0_73, %c0_74] : memref<8x128xf32, #tpu.memory_space<vmem>>, vector<8x128xf32>
    %259 = arith.negf %258 : vector<8x128xf32>
    %260 = math.exp %259 : vector<8x128xf32>
    %cst = arith.constant 1.000000e+00 : f32
    %261 = vector.broadcast %cst : f32 to vector<8x128xf32>
    %262 = arith.addf %261, %260 : vector<8x128xf32>
    %263 = arith.divf %261, %262 : vector<8x128xf32>
    %c0_75 = arith.constant 0 : index
    %c0_76 = arith.constant 0 : index
    %264 = vector.load %arg3[%c0_75, %c0_76] : memref<128x128xf32, #tpu.memory_space<vmem>>, vector<128x128xf32>
    %cst_77 = arith.constant dense<0.000000e+00> : vector<8x128xf32>
    %265 = tpu.matmul %263, %264, %cst_77 {dimension_numbers = #tpu.dot_dimension_numbers<[1], [1], [0], [0], [0, 0, 1, 0], [], []>} : vector<8x128xf32>, vector<128x128xf32>, vector<8x128xf32> -> vector<8x128xf32>
    %c0_78 = arith.constant 0 : index
    %c0_79 = arith.constant 0 : index
    %266 = vector.load %arg4[%c0_78, %c0_79] : memref<1x128xf32, #tpu.memory_space<vmem>>, vector<1x128xf32>
    %267 = vector.broadcast %266 : vector<1x128xf32> to vector<8x128xf32>
    %268 = arith.addf %265, %267 : vector<8x128xf32>
    %cst_80 = arith.constant dense<0xFF800000> : vector<8xf32>
    %269 = vector.multi_reduction <maximumf>, %268, %cst_80 [1] : vector<8x128xf32> to vector<8xf32>
    %270 = vector.shape_cast %269 : vector<8xf32> to vector<8x1xf32>
    %271 = vector.broadcast %270 : vector<8x1xf32> to vector<8x128xf32>
    %272 = arith.subf %268, %271 : vector<8x128xf32>
    %273 = math.exp %272 : vector<8x128xf32>
    %cst_81 = arith.constant dense<0.000000e+00> : vector<8xf32>
    %274 = vector.multi_reduction <add>, %273, %cst_81 [1] : vector<8x128xf32> to vector<8xf32>
    %275 = vector.shape_cast %274 : vector<8xf32> to vector<8x1xf32>
    %276 = math.log %275 : vector<8x1xf32>
    %277 = vector.broadcast %276 : vector<8x1xf32> to vector<8x128xf32>
    %278 = arith.subf %272, %277 : vector<8x128xf32>
    %c0_82 = arith.constant 0 : index
    %c0_83 = arith.constant 0 : index
    %279 = vector.load %arg5[%c0_82, %c0_83] : memref<8x128xf32, #tpu.memory_space<vmem>>, vector<8x128xf32>
    tpu.vector_store %arg5[%c0_82, %c0_83], %278 {strides = array<i32>} : memref<8x128xf32, #tpu.memory_space<vmem>>, vector<8x128xf32>,
    return
  }
  func.func @transform_0(%arg0: i32, %arg1: memref<32xi32, #tpu.memory_space<smem>>) -> (i32, i32) {
    %c0_i32 = arith.constant 0 : i32
    %c0_i32_0 = arith.constant 0 : i32
    %c0_i32_1 = arith.constant 0 : i32
    return %c0_i32, %c0_i32_0 : i32, i32
  }
  func.func @transform_1(%arg0: i32, %arg1: memref<32xi32, #tpu.memory_space<smem>>) -> (i32, i32) {
    %c0_i32 = arith.constant 0 : i32
    %c0_i32_0 = arith.constant 0 : i32
    %c0_i32_1 = arith.constant 0 : i32
    return %c0_i32, %c0_i32_0 : i32, i32
  }
  func.func @transform_2(%arg0: i32, %arg1: memref<32xi32, #tpu.memory_space<smem>>) -> (i32, i32) {
    %c0_i32 = arith.constant 0 : i32
    %c0_i32_0 = arith.constant 0 : i32
    %c0_i32_1 = arith.constant 0 : i32
    return %c0_i32, %c0_i32_0 : i32, i32
  }
  func.func @transform_3(%arg0: i32, %arg1: memref<32xi32, #tpu.memory_space<smem>>) -> (i32, i32) {
    %c0_i32 = arith.constant 0 : i32
    %c0_i32_0 = arith.constant 0 : i32
    return %arg0, %c0_i32 : i32, i32
  }
}

</mosaic_0001>

<bundles_post_ra>
// kernel: tpu_custom_call.1
= control target key start
LH: loop header
LB: loop body
LE: loop exit
PB: predicated region body
PF: predicated region fallthrough
CT: control target
= control target key end

     0   :  { %s476_s18 = smov [#allocation4]   ;;  %s537_s0 = inlined_call_operand.hbm [shape: s32[32], index: 0, kind: input, shape index: {}]   ;;  %s538_s1 = inlined_call_operand.hbm [shape: f32[128,128], index: 1, kind: input, shape index: {}]   ;;  %s539_s2 = inlined_call_operand.hbm [shape: f32[128,128], index: 2, kind: input, shape index: {}]   ;;  %s540_s3 = inlined_call_operand.vmem [shape: f32[1,128], index: 3, kind: input, shape index: {}]   ;;  %s541_s4 = inlined_call_operand.hbm [shape: f32[8,128], index: 4, kind: output, shape index: {}]  }
   0x1   :  { %s10_s17 = sshll.u32 %s537_s0, 4  ;;  %s11_s17 = int_to_ptr.hbm [resolvable:$true] %s10_s17 }
   0x2   :  { %13 = dma.hbm_to_smem %s11_s17, 16, %s476_s18, [#allocation3] }
   0x3   :  { %468 = dma.done.wait [#allocation3], 16 }
   0x4   :  { %469 = vsyncadd [#allocation3], 4294967280 }
   0x5   :  { %16 = sfence }
   0x6   :  { %17 = vsyncpa [#allocation6], 0 }
   0x7   :  { %18 = vsyncpa [#allocation9], 0 }
   0x8   :  { %19 = vsyncpa [#allocation7], 0  ;;  %s24_s21 = sshll.u32 %s538_s1, 4  ;;  %s477_s22 = smov [#allocation5]   ;;  %s25_s21 = int_to_ptr.hbm [resolvable:$true] %s24_s21 }
   0x9   :  { %s26_s23 = sshll.u32 %s477_s22, 4  ;;  %s37_s0 = sshll.u32 %s539_s2, 4  ;;  %s27_s23 = int_to_ptr.vmem [resolvable:$true] %s26_s23  ;;  %s38_s0 = int_to_ptr.hbm [resolvable:$true] %s37_s0 }
   0xa   :  { %s478_s26 = smov 128   ;;  %s479_s27 = smov 8  }
   0xb   :  { %32 = dma.hbm_to_vmem [thread:$0]  %s25_s21, 2048, %s27_s23, [#allocation6], %s478_s26, %s478_s26, %s479_s27  }
   0xc   :  { %s480_s28 = smov [#allocation8]  }
   0xd   :  { %s39_s29 = sshll.u32 %s480_s28, 4  ;;  %s40_s29 = int_to_ptr.vmem [resolvable:$true] %s39_s29 }
   0xe   :  { %45 = dma.hbm_to_vmem [thread:$0]  %s38_s0, 2048, %s40_s29, [#allocation9], %s478_s26, %s478_s26, %s479_s27  }
   0xf   :  { %470 = dma.done.wait [#allocation6], 2048  }
  0x10   :  { %471 = vsyncadd [#allocation6], 4294965248 }
  0x11   :  { %472 = dma.done.wait [#allocation9], 2048  }
  0x12   :  { %473 = vsyncadd [#allocation9], 4294965248  ;;  %s57_s1 = sld [smem:[#allocation4]]  ;;  %v251_v0 = vld [vmem:[#allocation8 + $0x78] sm:$0xff]  ;;  %v250_v1 = vld [vmem:[#allocation8 + $0x70] sm:$0xff] }
  0x13   :  { %s337_s30 = sld [smem:[#allocation4 + $0x1]]  ;;  %256 = vmatpush.xpose.msra.mxu0 %v251_v0  ;;  %v249_v8 = vld [vmem:[#allocation8 + $0x68] sm:$0xff]  ;;  %v248_v15 = vld [vmem:[#allocation8 + $0x60] sm:$0xff]  ;;  %v247_v22 = vld [vmem:[#allocation8 + $0x58] sm:$0xff] }
  0x14   :  { %s338_s5 = sld [smem:[#allocation4 + $0x2]]  ;;  %v246_v30 = vld [vmem:[#allocation8 + $0x50] sm:$0xff]  ;;  %v245_v36 = vld [vmem:[#allocation8 + $0x48] sm:$0xff]  ;;  %v244_v43 = vld [vmem:[#allocation8 + $0x40] sm:$0xff] }
  0x15   :  { %s339_s6 = sld [smem:[#allocation4 + $0x3]]  ;;  %v243_v51 = vld [vmem:[#allocation8 + $0x38] sm:$0xff]  ;;  %v242_v58 = vld [vmem:[#allocation8 + $0x30] sm:$0xff] }
  0x16   :  { %s340_s7 = sld [smem:[#allocation4 + $0x4]] }
  0x17   :  { %s341_s8 = sld [smem:[#allocation4 + $0x5]]  ;;  %257 = vmatpush.xpose.msra.mxu0 %v250_v1  ;;  %v241_v1 = vld [vmem:[#allocation8 + $0x28] sm:$0xff] }
  0x18   :  { %s342_s2 = sld [smem:[#allocation4 + $0x6]]  ;;  %s58_s11 = scalar_lea.vmem [#allocation5], %s57_s1 }
  0x19   :  { %s343_s9 = sld [smem:[#allocation4 + $0x7]]  ;;  %v59_v2 = vld [vmem:[%s58_s11] sm:$0x1]  ;;  %s62_s12 = scalar_lea.vmem [#allocation5], %s337_s30 }
  0x1a   :  { %s516_s10 = sld [smem:[#allocation4 + $0x8]]  ;;  %v63_v3 = vld [vmem:[%s62_s12] sm:$0x1]  ;;  %s67_s13 = scalar_lea.vmem [#allocation5], %s338_s5 }
  0x1b   :  { %v64_v4 = vadd.f32 %v63_v3, %v59_v2  ;;  %v68_v5 = vld [vmem:[%s67_s13] sm:$0x1]  ;;  %s72_s14 = scalar_lea.vmem [#allocation5], %s339_s6  ;;  %s345_s16 = sld [smem:[#allocation4 + $0x9]]  ;;  %258 = vmatpush.xpose.msra.mxu0 %v249_v8  ;;  %v240_v3 = vld [vmem:[#allocation8 + $0x20] sm:$0xff]  ;;  %v237_v8 = vld [vmem:[#allocation8 + $0x8] sm:$0xff] }
  0x1c   :  { %v73_v6 = vld [vmem:[%s72_s14] sm:$0x1]  ;;  %s78_s15 = scalar_lea.vmem [#allocation5], %s340_s7  ;;  %s346_s18 = sld [smem:[#allocation4 + $0xa]] }
  0x1d   :  { %v79_v7 = vld [vmem:[%s78_s15] sm:$0x1]  ;;  %v69_v9 = vadd.f32 %v68_v5, %v64_v4  ;;  %s82_s17 = scalar_lea.vmem [#allocation5], %s341_s8  ;;  %s347_s20 = sld [smem:[#allocation4 + $0xb]] }
  0x1e   :  { %v83_v10 = vld [vmem:[%s82_s17] sm:$0x1]  ;;  %s87_s19 = scalar_lea.vmem [#allocation5], %s342_s2  ;;  %s348_s22 = sld [smem:[#allocation4 + $0xc]] }
  0x1f   :  { %v84_v11 = vadd.f32 %v83_v10, %v79_v7  ;;  %v88_v12 = vld [vmem:[%s87_s19] sm:$0x1]  ;;  %v74_v13 = vadd.f32 %v73_v6, %v69_v9  ;;  %s92_s21 = scalar_lea.vmem [#allocation5], %s343_s9  ;;  %s349_s24 = sld [smem:[#allocation4 + $0xd]]  ;;  %259 = vmatpush.xpose.msra.mxu0 %v248_v15  ;;  %v238_v7 = vld [vmem:[#allocation8 + $0x10] sm:$0xff]  ;;  %v236_v10 = vld [vmem:[#allocation8] sm:$0xff] }
  0x20   :  { %v93_v14 = vld [vmem:[%s92_s21] sm:$0x1]  ;;  %s98_s23 = scalar_lea.vmem [#allocation5], %s516_s10  ;;  %s350_s25 = sld [smem:[#allocation4 + $0xe]] }
  0x21   :  { %v89_v16 = vadd.f32 %v88_v12, %v84_v11  ;;  %v99_v17 = vld [vmem:[%s98_s23] sm:$0x1]  ;;  %75 = vst [vmem:[#allocation2] sm:$0x1] %v74_v13  ;;  %s351_s0 = sld [smem:[#allocation4 + $0xf]]  ;;  %s102_s26 = scalar_lea.vmem [#allocation5], %s345_s16 }
  0x22   :  { %v103_v19 = vld [vmem:[%s102_s26] sm:$0x1]  ;;  %s519_s27 = sld [smem:[#allocation4 + $0x10]]  ;;  %s107_s28 = scalar_lea.vmem [#allocation5], %s346_s18 }
  0x23   :  { %v94_v18 = vadd.f32 %v93_v14, %v89_v16  ;;  %v104_v20 = vadd.f32 %v103_v19, %v99_v17  ;;  %v108_v21 = vld [vmem:[%s107_s28] sm:$0x1]  ;;  %s112_s29 = scalar_lea.vmem [#allocation5], %s347_s20  ;;  %s353_s1 = sld [smem:[#allocation4 + $0x11]]  ;;  %260 = vmatpush.xpose.msra.mxu0 %v247_v22 }
  0x24   :  { %v113_v23 = vld [vmem:[%s112_s29] sm:$0x1]  ;;  %s118_s30 = scalar_lea.vmem [#allocation5], %s348_s22  ;;  %s354_s5 = sld [smem:[#allocation4 + $0x12]] }
  0x25   :  { %95 = vst [vmem:[#allocation2 + $0x1] sm:$0x1] %v94_v18  ;;  %v109_v24 = vadd.f32 %v108_v21, %v104_v20  ;;  %v119_v25 = vld [vmem:[%s118_s30] sm:$0x1]  ;;  %s122_s6 = scalar_lea.vmem [#allocation5], %s349_s24  ;;  %s521_s7 = sld [smem:[#allocation4 + $0x13]] }
  0x26   :  { %v123_v26 = vld [vmem:[%s122_s6] sm:$0x1]  ;;  %s127_s8 = scalar_lea.vmem [#allocation5], %s350_s25  ;;  %s356_s2 = sld [smem:[#allocation4 + $0x14]] }
  0x27   :  { %v114_v27 = vadd.f32 %v113_v23, %v109_v24  ;;  %v124_v28 = vadd.f32 %v123_v26, %v119_v25  ;;  %v128_v29 = vld [vmem:[%s127_s8] sm:$0x1]  ;;  %s132_s9 = scalar_lea.vmem [#allocation5], %s351_s0  ;;  %s357_s10 = sld [smem:[#allocation4 + $0x15]]  ;;  %261 = vmatpush.xpose.msra.mxu0 %v246_v30 }
  0x28   :  { %v133_v31 = vld [vmem:[%s132_s9] sm:$0x1]  ;;  %s138_s11 = scalar_lea.vmem [#allocation5], %s519_s27  ;;  %s358_s12 = sld [smem:[#allocation4 + $0x16]] }
  0x29   :  { %115 = vst [vmem:[#allocation2 + $0x2] sm:$0x1] %v114_v27  ;;  %v129_v32 = vadd.f32 %v128_v29, %v124_v28  ;;  %v139_v33 = vld [vmem:[%s138_s11] sm:$0x1]  ;;  %s524_s13 = sld [smem:[#allocation4 + $0x17]]  ;;  %s142_s14 = scalar_lea.vmem [#allocation5], %s353_s1 }
  0x2a   :  { %v143_v35 = vld [vmem:[%s142_s14] sm:$0x1]  ;;  %s526_s15 = sld [smem:[#allocation4 + $0x18]]  ;;  %s147_s16 = scalar_lea.vmem [#allocation5], %s354_s5 }
  0x2b   :  { %v134_v34 = vadd.f32 %v133_v31, %v129_v32  ;;  %v144_v37 = vadd.f32 %v143_v35, %v139_v33  ;;  %v148_v38 = vld [vmem:[%s147_s16] sm:$0x1]  ;;  %s361_s17 = sld [smem:[#allocation4 + $0x19]]  ;;  %s152_s18 = scalar_lea.vmem [#allocation5], %s521_s7  ;;  %262 = vmatpush.xpose.msra.mxu0 %v245_v36 }
  0x2c   :  { %v153_v39 = vld [vmem:[%s152_s18] sm:$0x1]  ;;  %s158_s19 = scalar_lea.vmem [#allocation5], %s356_s2  ;;  %s362_s20 = sld [smem:[#allocation4 + $0x1a]] }
  0x2d   :  { %135 = vst [vmem:[#allocation2 + $0x3] sm:$0x1] %v134_v34  ;;  %v149_v40 = vadd.f32 %v148_v38, %v144_v37  ;;  %v159_v41 = vld [vmem:[%s158_s19] sm:$0x1]  ;;  %s162_s21 = scalar_lea.vmem [#allocation5], %s357_s10  ;;  %s363_s22 = sld [smem:[#allocation4 + $0x1b]] }
  0x2e   :  { %v163_v42 = vld [vmem:[%s162_s21] sm:$0x1]  ;;  %s167_s23 = scalar_lea.vmem [#allocation5], %s358_s12  ;;  %s364_s24 = sld [smem:[#allocation4 + $0x1c]] }
  0x2f   :  { %v154_v44 = vadd.f32 %v153_v39, %v149_v40  ;;  %v164_v45 = vadd.f32 %v163_v42, %v159_v41  ;;  %v168_v46 = vld [vmem:[%s167_s23] sm:$0x1]  ;;  %s172_s25 = scalar_lea.vmem [#allocation5], %s524_s13  ;;  %s365_s0 = sld [smem:[#allocation4 + $0x1d]]  ;;  %263 = vmatpush.xpose.msra.mxu0 %v244_v43 }
  0x30   :  { %v173_v47 = vld [vmem:[%s172_s25] sm:$0x1]  ;;  %s178_s26 = scalar_lea.vmem [#allocation5], %s526_s15  ;;  %s366_s28 = sld [smem:[#allocation4 + $0x1e]] }
  0x31   :  { %155 = vst [vmem:[#allocation2 + $0x4] sm:$0x1] %v154_v44  ;;  %v169_v48 = vadd.f32 %v168_v46, %v164_v45  ;;  %v179_v49 = vld [vmem:[%s178_s26] sm:$0x1]  ;;  %s182_s27 = scalar_lea.vmem [#allocation5], %s361_s17  ;;  %s367_s29 = sld [smem:[#allocation4 + $0x1f]] }
  0x32   :  { %v183_v50 = vld [vmem:[%s182_s27] sm:$0x1]  ;;  %s187_s1 = scalar_lea.vmem [#allocation5], %s362_s20  ;;  %s481_s10 = smov [#allocation10]  }
  0x33   :  { %v174_v52 = vadd.f32 %v173_v47, %v169_v48  ;;  %v184_v53 = vadd.f32 %v183_v50, %v179_v49  ;;  %v188_v54 = vld [vmem:[%s187_s1] sm:$0x1]  ;;  %s192_s30 = scalar_lea.vmem [#allocation5], %s363_s22  ;;  %264 = vmatpush.xpose.msra.mxu0 %v243_v51  ;;  %s292_s11 = sshll.u32 %s481_s10, 4  ;;  %s293_s11 = int_to_ptr.vmem [resolvable:$true] %s292_s11 }
  0x34   :  { %v193_v56 = vld [vmem:[%s192_s30] sm:$0x1]  ;;  %s198_s5 = scalar_lea.vmem [#allocation5], %s364_s24  ;;  %s294_s14 = sshll.u32 %s541_s4, 4  ;;  %s295_s14 = int_to_ptr.hbm [resolvable:$true] %s294_s14 }
  0x35   :  { %175 = vst [vmem:[#allocation2 + $0x5] sm:$0x1] %v174_v52  ;;  %v189_v55 = vadd.f32 %v188_v54, %v184_v53  ;;  %v199_v57 = vld [vmem:[%s198_s5] sm:$0x1]  ;;  %s202_s6 = scalar_lea.vmem [#allocation5], %s365_s0 }
  0x36   :  { %v203_v60 = vld [vmem:[%s202_s6] sm:$0x1]  ;;  %s207_s7 = scalar_lea.vmem [#allocation5], %s366_s28 }
  0x37   :  { %v194_v59 = vadd.f32 %v193_v56, %v189_v55  ;;  %v204_v61 = vadd.f32 %v203_v60, %v199_v57  ;;  %v208_v62 = vld [vmem:[%s207_s7] sm:$0x1]  ;;  %265 = vmatpush.xpose.msra.mxu0 %v242_v58  ;;  %s212_s8 = scalar_lea.vmem [#allocation5], %s367_s29 }
  0x38   :  { %v213_v0 = vld [vmem:[%s212_s8] sm:$0x1] }
  0x39   :  { %195 = vst [vmem:[#allocation2 + $0x6] sm:$0x1] %v194_v59  ;;  %v209_v63 = vadd.f32 %v208_v62, %v204_v61  ;;  %v239_v4 = vld [vmem:[#allocation8 + $0x18] sm:$0xff] }
  0x3a   :  { %v375_v22 = vld [vmem:[%s540_s3] ss:$0 sm:$0xff] }
  0x3b   :  { %v214_v2 = vadd.f32 %v213_v0, %v209_v63  ;;  %266 = vmatpush.xpose.msra.mxu0 %v241_v1 }
  0x3d   :  { %215 = vst [vmem:[#allocation2 + $0x7] sm:$0x1] %v214_v2 }
  0x3f   :  { %267 = vmatpush.xpose.msra.mxu0 %v240_v3 }
  0x43   :  { %268 = vmatpush.xpose.msra.mxu0 %v239_v4 }
  0x44   :  { %v216_v5 = vld [vmem:[#allocation2] sm:$0xff] }
  0x45   :  { %v368_v6 = vmul.f32 -1.442695, %v216_v5 }
  0x47   :  { %376 = vpow2.f32 %v368_v6  ;;  %269 = vmatpush.xpose.msra.mxu0 %v238_v7 }
  0x4b   :  { %270 = vmatpush.xpose.msra.mxu0 %v237_v8 }
  0x4d   :  { %v377_v9 = vpop.eup %376 }
  0x4e   :  { %v220_v11 = vadd.f32 1.0, %v377_v9 }
  0x4f   :  { %271 = vmatpush.xpose.msra.mxu0 %v236_v10 }
  0x50   :  { %378 = vrcp.f32 %v220_v11  ;;  %v232_v14 = vand.u32 2147483648, %v220_v11  ;;  %vm226_vm0 = vweird.f32 %v220_v11  ;;  %v230_v16 = vand.u32 2147483647, %v220_v11 }
  0x52   :  { %v233_v18 = vor.u32 1.1754944e-38, %v232_v14  ;;  %vm231_vm3 = vcmp.eq.f32.partialorder %v230_v16, 8.507059e+37 }
  0x56   :  { %v379_v12 = vpop.eup %378 }
  0x57   :  { %v222_v13 = vmul.f32 %v379_v12, %v220_v11  ;;  %vm227_vm1 = vweird.f32 %v379_v12 }
  0x58   :  { %vm228_vm2 = vmor %vm226_vm0, %vm227_vm1 }
  0x59   :  { %v223_v15 = vsub.f32 1.0, %v222_v13 }
  0x5b   :  { %v224_v17 = vmul.f32 %v379_v12, %v223_v15 }
  0x5d   :  { %v225_v19 = vadd.f32 %v379_v12, %v224_v17 }
  0x5f   :  { %v229_v20 = vsel %vm228_vm2, %v379_v12, %v225_v19 }
  0x60   :  { %v234_v21 = vsel %vm231_vm3, %v233_v18, %v229_v20 }
  0x61   :  { %272 = vmatmul.f32.vlgmr.msra.gmra.mxu0 %v234_v21 }
  0xde   :  { %v273_v23 = vpop.f32.mrf.mxu0 }
  0xdf   :  { %v274_v24 = vadd.f32 %v375_v22, %v273_v23 }
  0xe1   :  { %276 = vmax.xlane.f32.xlu0 %v274_v24 }
 0x154   :  { %v277_v25 = vpop.xlane.xlu0 %276 }
 0x155   :  { %v278_v26 = vsub.f32 %v274_v24, %v277_v25 }
 0x157   :  { %v279_v27 = vmul.f32 1.442695, %v278_v26 }
 0x159   :  { %380 = vpow2.f32 %v279_v27 }
 0x15f   :  { %v381_v28 = vpop.eup %380 }
 0x160   :  { %281 = vadd.xlane.f32.xlu0 %v381_v28 }
 0x1d3   :  { %v282_v29 = vpop.xlane.xlu0 %281 }
 0x1d4   :  { %382 = vlog2.f32 %v282_v29 }
 0x1da   :  { %v383_v30 = vpop.eup %382 }
 0x1db   :  { %v284_v31 = vmul.f32 0.6931472, %v383_v30 }
 0x1dd   :  { %v285_v32 = vsub.f32 %v278_v26, %v284_v31 }
 0x1df   :  { %286 = vst [vmem:[#allocation10] sm:$0xff] %v285_v32 }
 0x1e0   :  { %297 = dma.vmem_to_hbm [thread:$0]  %s293_s11, 128, %s295_s14, [#allocation7]  }
 0x1e1   :  { %474 = dma.done.wait [#allocation7], 128  }
 0x1e2   :  { %475 = vsyncadd [#allocation7], 4294967168 }
 0x1e3   :  { %302 = vsyncpa [#allocation6], 1 }
 0x1e4   :  { %303 = vsyncpa [#allocation9], 1 }
 0x1e5   :  { %304 = vsyncpa [#allocation7], 1 }

</bundles_post_ra>
